<compile_context>
chip_gen: v7x
topology: tpu7x:2x2x1
jax: 0.10.0
libtpu: 0.0.40
codegen_flags: <defaults>
</compile_context>

<pallas_src>
import functools

import jax
import jax.numpy as jnp
from jax.experimental import pallas as pl
from jax.experimental.pallas import tpu as pltpu

_LANES = 128
_BIAS_ROWS = 8  # rows 0/1/2 = fused b1/b2/b3, rest zero padding


def _round_up(x, m):
    return ((x + m - 1) // m) * m


# ----------------------------------------------------------------------------
# Kernel
# ----------------------------------------------------------------------------
def _policy_ppo_kernel(x_ref, p_ref, out_ref, *, action_num, s_pad):
    A = action_num
    x = x_ref[...]                                    # (TB, S_pad)

    # Single packed parameter slab: [W1 | W2 | W3 | biases] along sublanes.
    w1 = p_ref[0:s_pad, :]                            # (S_pad, 128)
    w2 = p_ref[s_pad:s_pad + _LANES, :]               # (128, 128)
    w3 = p_ref[s_pad + _LANES:s_pad + 2 * _LANES, :]  # (128, 128)
    bias = p_ref[s_pad + 2 * _LANES:s_pad + 2 * _LANES + _BIAS_ROWS, :]  # (8,128)
    b1 = bias[0:1, :]
    b2 = bias[1:2, :]
    b3 = bias[2:3, :]

    # Fused action+value MLP: 3 matmuls instead of 6 (block-diagonal weights).
    h = jnp.tanh(jnp.dot(x, w1, preferred_element_type=jnp.float32) + b1)
    h = jnp.tanh(jnp.dot(h, w2, preferred_element_type=jnp.float32) + b2)
    out = jnp.dot(h, w3, preferred_element_type=jnp.float32) + b3  # (TB, 128)
    # lanes [0:A] = action logits, lane A = state value, lanes >= A+1 are zero.

    lane = jax.lax.broadcasted_iota(jnp.int32, out.shape, 1)
    amask = lane < A

    # Numerically-stable softmax restricted to the action lanes.
    logits = jnp.where(amask, out, jnp.float32(-1e30))
    m = jnp.max(logits, axis=-1, keepdims=True)
    e = jnp.exp(logits - m)                           # exactly 0 outside action lanes
    denom = jnp.sum(e, axis=-1, keepdims=True)
    probs = e / denom                                 # exact recip: rows sum to 1 @1e-5
    logz = m + jnp.log(denom)
    logp = jnp.where(amask, out - logz, 0.0)          # log_probs (0 outside action lanes)
    entropy = -jnp.sum(probs * logp, axis=-1, keepdims=True)  # (TB, 1)

    # Assemble ONE lane-dense 128-wide output (single unmasked store):
    #   [0:A) probs | [A] value | [A+1:2A+1) log_probs | [2A+1] entropy | 0...
    value_lane = jnp.where(lane == A, out, 0.0)
    logp_lanes = pltpu.roll(logp, A + 1, 1)           # XLU shift into lanes [A+1:2A+1)
    ent_lanes = entropy * (lane == (2 * A + 1)).astype(jnp.float32)
    out_ref[...] = probs + value_lane + logp_lanes + ent_lanes


# ----------------------------------------------------------------------------
# Wrapper
# ----------------------------------------------------------------------------
@functools.partial(jax.jit, static_argnames=("action_num",))
def policy_ppo_forward(state, param_slab, *, action_num):
    """Returns (probs [B,A], value [B,1], log_probs [B,A], entropy [B])."""
    B, S = state.shape
    A = action_num
    s_pad = param_slab.shape[0] - (2 * _LANES + _BIAS_ROWS)

    # Batch tiling: multiple of 8 rows; big tiles + parallel grid for PPO-update
    # sized batches (megacore sharding on v7x), single tile for rollout batches.
    TB = 256 if B >= 256 else _round_up(B, 8)
    B_pad = _round_up(B, TB)
    x = jnp.pad(state.astype(jnp.float32), ((0, B_pad - B), (0, s_pad - S)))

    flops = 2 * B_pad * (s_pad * _LANES + _LANES * _LANES + _LANES * _LANES)
    transcendentals = B_pad * (2 * _LANES + A + 2)
    bytes_accessed = (x.size + param_slab.size + B_pad * _LANES) * 4

    kernel = functools.partial(_policy_ppo_kernel, action_num=A, s_pad=s_pad)
    combo = pl.pallas_call(
        kernel,
        out_shape=jax.ShapeDtypeStruct((B_pad, _LANES), jnp.float32),
        grid=(B_pad // TB,),
        in_specs=[
            pl.BlockSpec((TB, s_pad), lambda i: (i, 0)),
            pl.BlockSpec((param_slab.shape[0], _LANES), lambda i: (0, 0)),
        ],
        out_specs=pl.BlockSpec((TB, _LANES), lambda i: (i, 0)),
        compiler_params=pltpu.CompilerParams(
            dimension_semantics=("parallel",)),
        cost_estimate=pl.CostEstimate(
            flops=int(flops),
            transcendentals=int(transcendentals),
            bytes_accessed=int(bytes_accessed)),
    )(x, param_slab)

    combo = combo[:B]
    probs = combo[:, :A]
    value = combo[:, A:A + 1]
    log_probs = combo[:, A + 1:2 * A + 1]
    entropy = combo[:, 2 * A + 1]
    return probs, value, log_probs, entropy


# ----------------------------------------------------------------------------
# Parameters (PyTorch nn.Linear init, fused + packed once, outside hot path)
# ----------------------------------------------------------------------------
def make_params(key, state_dim, action_num, hidden_dim):
    assert 2 * hidden_dim <= _LANES, "fused hidden width must fit one 128-lane tile"
    assert 2 * action_num + 2 <= _LANES, "packed output layout must fit 128 lanes"
    ks = jax.random.split(key, 12)

    def lin(kw, kb, fan_in, fan_out):
        bound = 1.0 / (float(fan_in) ** 0.5)
        w = jax.random.uniform(kw, (fan_in, fan_out), jnp.float32, -bound, bound)
        b = jax.random.uniform(kb, (fan_out,), jnp.float32, -bound, bound)
        return w, b

    w1a, b1a = lin(ks[0], ks[1], state_dim, hidden_dim)
    w2a, b2a = lin(ks[2], ks[3], hidden_dim, hidden_dim)
    w3a, b3a = lin(ks[4], ks[5], hidden_dim, action_num)
    w1v, b1v = lin(ks[6], ks[7], state_dim, hidden_dim)
    w2v, b2v = lin(ks[8], ks[9], hidden_dim, hidden_dim)
    w3v, b3v = lin(ks[10], ks[11], hidden_dim, 1)

    H, A, S = hidden_dim, action_num, state_dim
    s_pad = _round_up(S, 8)

    # Fused layer 1: [W1a | W1v], lane-padded to 128.
    w1f = jnp.zeros((s_pad, _LANES), jnp.float32)
    w1f = w1f.at[:S, :H].set(w1a).at[:S, H:2 * H].set(w1v)
    # Fused layer 2: blockdiag(W2a, W2v).
    w2f = jnp.zeros((_LANES, _LANES), jnp.float32)
    w2f = w2f.at[:H, :H].set(w2a).at[H:2 * H, H:2 * H].set(w2v)
    # Fused layer 3: blockdiag(W3a, W3v) -> logits in lanes [0:A], value lane A.
    w3f = jnp.zeros((_LANES, _LANES), jnp.float32)
    w3f = w3f.at[:H, :A].set(w3a).at[H:2 * H, A].set(w3v[:, 0])
    # Fused biases (zero padding keeps tanh(0)=0 in unused lanes).
    biases = jnp.zeros((_BIAS_ROWS, _LANES), jnp.float32)
    biases = biases.at[0, :H].set(b1a).at[0, H:2 * H].set(b1v)
    biases = biases.at[1, :H].set(b2a).at[1, H:2 * H].set(b2v)
    biases = biases.at[2, :A].set(b3a).at[2, A].set(b3v[0])

    slab = jnp.concatenate([w1f, w2f, w3f, biases], axis=0)  # single DMA slab

    return dict(slab=slab,
                w1a=w1a, b1a=b1a, w2a=w2a, b2a=b2a, w3a=w3a, b3a=b3a,
                w1v=w1v, b1v=b1v, w2v=w2v, b2v=b2v, w3v=w3v, b3v=b3v)


def reference_forward(state, p):
    """Plain-JAX reference of the PyTorch forward (for correctness check)."""
    h = jnp.tanh(state @ p["w1a"] + p["b1a"])
    h = jnp.tanh(h @ p["w2a"] + p["b2a"])
    logits = h @ p["w3a"] + p["b3a"]
    probs = jax.nn.softmax(logits, axis=-1)
    logp = jax.nn.log_softmax(logits, axis=-1)
    v = jnp.tanh(state @ p["w1v"] + p["b1v"])
    v = jnp.tanh(v @ p["w2v"] + p["b2v"])
    value = v @ p["w3v"] + p["b3v"]
    entropy = -jnp.sum(probs * logp, axis=-1)
    return probs, value, logp, entropy


def distribution_glue(probs, log_probs, action=None, key=None):
    """Categorical sample / log_prob gather (only the sample stays outside)."""
    # TODO(synk): Categorical.sample() + .item() and the Python-list episode
    # buffers in the PyTorch module are host-side RNG/bookkeeping, kept in JAX.
    if action is None:
        action = jax.random.categorical(key, log_probs, axis=-1)
    logprob = jnp.take_along_axis(log_probs, action[:, None], axis=-1)[:, 0]
    return action, logprob


if __name__ == "__main__":
    # Small shapes consistent with the module: state_dim=16, hidden=32, 4 actions.
    B, STATE_DIM, ACTION_NUM, HIDDEN = 8, 16, 4, 32

    key = jax.random.PRNGKey(0)
    k_state, k_params, k_sample = jax.random.split(key, 3)

    state = jax.random.normal(k_state, (B, STATE_DIM), dtype=jnp.float32)
    params = make_params(k_params, STATE_DIM, ACTION_NUM, HIDDEN)

    probs, value, log_probs, entropy = policy_ppo_forward(
        state, params["slab"], action_num=ACTION_NUM)
    probs = jax.block_until_ready(probs)
    value = jax.block_until_ready(value)
    log_probs = jax.block_until_ready(log_probs)
    entropy = jax.block_until_ready(entropy)

    # Distribution glue (sampling / log_prob), as in forward().
    action, logprob = distribution_glue(probs, log_probs, key=k_sample)
    mean_entropy = entropy.mean()
    jax.block_until_ready(mean_entropy)

    # Shape / contract checks.
    assert probs.shape == (B, ACTION_NUM)
    assert value.shape == (B, 1)
    assert log_probs.shape == (B, ACTION_NUM)
    assert entropy.shape == (B,)
    assert jnp.allclose(jnp.sum(probs, axis=-1), 1.0, atol=1e-5)

    # Cross-check against the plain-JAX reference (loose tol: MXU f32 matmuls
    # may take a reduced-precision pass under default XLA precision).
    p_ref, v_ref, lp_ref, ent_ref = reference_forward(state, params)
    assert jnp.allclose(probs, p_ref, atol=2e-2, rtol=2e-2)
    assert jnp.allclose(value, v_ref, atol=2e-2, rtol=2e-2)
    assert jnp.allclose(log_probs, lp_ref, atol=2e-2, rtol=2e-2)
    assert jnp.allclose(entropy, ent_ref, atol=2e-2, rtol=2e-2)

    print("KERNEL_OK")
</pallas_src>

<mosaic_0001>
module attributes {stable_mosaic.version = 11 : i64} {
  func.func @_policy_ppo_kernel(%arg0: i32, %arg1: memref<8x16xf32, #tpu.memory_space<vmem>>, %arg2: memref<280x128xf32, #tpu.memory_space<vmem>>, %arg3: memref<8x128xf32, #tpu.memory_space<vmem>>) attributes {dimension_semantics = [#tpu.dimension_semantics<parallel>], iteration_bounds = array<i64: 1>, scalar_prefetch = 0 : i64, scratch_operands = 0 : i64, tpu.core_type = #tpu.core_type<tc>, window_params = [{transform_indices = @transform_0, window_bounds = array<i64: 8, 16>}, {pipeline_mode = #tpu.pipeline_mode<synchronous>, transform_indices = @transform_1, window_bounds = array<i64: 280, 128>}, {transform_indices = @transform_2, window_bounds = array<i64: 8, 128>}]} {
    %c0 = arith.constant 0 : index
    %c0_0 = arith.constant 0 : index
    %0 = vector.load %arg1[%c0, %c0_0] : memref<8x16xf32, #tpu.memory_space<vmem>>, vector<8x16xf32>
    %c0_1 = arith.constant 0 : index
    %c0_2 = arith.constant 0 : index
    %1 = vector.load %arg2[%c0_1, %c0_2] : memref<280x128xf32, #tpu.memory_space<vmem>>, vector<16x128xf32>
    %c16 = arith.constant 16 : index
    %c0_3 = arith.constant 0 : index
    %2 = vector.load %arg2[%c16, %c0_3] : memref<280x128xf32, #tpu.memory_space<vmem>>, vector<128x128xf32>
    %c144 = arith.constant 144 : index
    %c0_4 = arith.constant 0 : index
    %3 = vector.load %arg2[%c144, %c0_4] : memref<280x128xf32, #tpu.memory_space<vmem>>, vector<128x128xf32>
    %c272 = arith.constant 272 : index
    %c0_5 = arith.constant 0 : index
    %4 = vector.load %arg2[%c272, %c0_5] : memref<280x128xf32, #tpu.memory_space<vmem>>, vector<8x128xf32>
    %5 = vector.extract_strided_slice %4 {offsets = [0, 0], sizes = [1, 128], strides = [1, 1]} : vector<8x128xf32> to vector<1x128xf32>
    %6 = vector.extract_strided_slice %4 {offsets = [1, 0], sizes = [1, 128], strides = [1, 1]} : vector<8x128xf32> to vector<1x128xf32>
    %7 = vector.extract_strided_slice %4 {offsets = [2, 0], sizes = [1, 128], strides = [1, 1]} : vector<8x128xf32> to vector<1x128xf32>
    %cst = arith.constant dense<0.000000e+00> : vector<8x128xf32>
    %8 = tpu.matmul %0, %1, %cst {dimension_numbers = #tpu.dot_dimension_numbers<[1], [0], [0], [1], [0, 0, 1, 1], [], []>} : vector<8x16xf32>, vector<16x128xf32>, vector<8x128xf32> -> vector<8x128xf32>
    %9 = vector.broadcast %5 : vector<1x128xf32> to vector<8x128xf32>
    %10 = arith.addf %8, %9 : vector<8x128xf32>
    %11 = math.tanh %10 : vector<8x128xf32>
    %cst_6 = arith.constant dense<0.000000e+00> : vector<8x128xf32>
    %12 = tpu.matmul %11, %2, %cst_6 {dimension_numbers = #tpu.dot_dimension_numbers<[1], [0], [0], [1], [0, 0, 1, 1], [], []>} : vector<8x128xf32>, vector<128x128xf32>, vector<8x128xf32> -> vector<8x128xf32>
    %13 = vector.broadcast %6 : vector<1x128xf32> to vector<8x128xf32>
    %14 = arith.addf %12, %13 : vector<8x128xf32>
    %15 = math.tanh %14 : vector<8x128xf32>
    %cst_7 = arith.constant dense<0.000000e+00> : vector<8x128xf32>
    %16 = tpu.matmul %15, %3, %cst_7 {dimension_numbers = #tpu.dot_dimension_numbers<[1], [0], [0], [1], [0, 0, 1, 1], [], []>} : vector<8x128xf32>, vector<128x128xf32>, vector<8x128xf32> -> vector<8x128xf32>
    %17 = vector.broadcast %7 : vector<1x128xf32> to vector<8x128xf32>
    %18 = arith.addf %16, %17 : vector<8x128xf32>
    %19 = tpu.iota {dimensions = array<i32: 1>} : vector<8x128xi32>
    %c4_i32 = arith.constant 4 : i32
    %20 = vector.broadcast %c4_i32 : i32 to vector<8x128xi32>
    %21 = arith.cmpi slt, %19, %20 : vector<8x128xi32>
    %cst_8 = arith.constant -1.000000e+30 : f32
    %22 = vector.broadcast %cst_8 : f32 to vector<8x128xf32>
    %23 = arith.select %21, %18, %22 : vector<8x128xi1>, vector<8x128xf32>
    %cst_9 = arith.constant dense<0xFF800000> : vector<8xf32>
    %24 = vector.multi_reduction <maximumf>, %23, %cst_9 [1] : vector<8x128xf32> to vector<8xf32>
    %25 = vector.shape_cast %24 : vector<8xf32> to vector<8x1xf32>
    %26 = vector.broadcast %25 : vector<8x1xf32> to vector<8x128xf32>
    %27 = arith.subf %23, %26 : vector<8x128xf32>
    %28 = math.exp %27 : vector<8x128xf32>
    %cst_10 = arith.constant dense<0.000000e+00> : vector<8xf32>
    %29 = vector.multi_reduction <add>, %28, %cst_10 [1] : vector<8x128xf32> to vector<8xf32>
    %30 = vector.shape_cast %29 : vector<8xf32> to vector<8x1xf32>
    %31 = vector.broadcast %30 : vector<8x1xf32> to vector<8x128xf32>
    %32 = arith.divf %28, %31 : vector<8x128xf32>
    %33 = math.log %30 : vector<8x1xf32>
    %34 = arith.addf %25, %33 : vector<8x1xf32>
    %35 = vector.broadcast %34 : vector<8x1xf32> to vector<8x128xf32>
    %36 = arith.subf %18, %35 : vector<8x128xf32>
    %cst_11 = arith.constant 0.000000e+00 : f32
    %37 = vector.broadcast %cst_11 : f32 to vector<8x128xf32>
    %38 = arith.select %21, %36, %37 : vector<8x128xi1>, vector<8x128xf32>
    %39 = arith.mulf %32, %38 : vector<8x128xf32>
    %cst_12 = arith.constant dense<0.000000e+00> : vector<8xf32>
    %40 = vector.multi_reduction <add>, %39, %cst_12 [1] : vector<8x128xf32> to vector<8xf32>
    %41 = vector.shape_cast %40 : vector<8xf32> to vector<8x1xf32>
    %cst_13 = arith.constant 0.000000e+00 : f32
    %42 = vector.broadcast %cst_13 : f32 to vector<8x1xf32>
    %43 = arith.subf %42, %41 : vector<8x1xf32>
    %c4_i32_14 = arith.constant 4 : i32
    %44 = vector.broadcast %c4_i32_14 : i32 to vector<8x128xi32>
    %45 = arith.cmpi eq, %19, %44 : vector<8x128xi32>
    %cst_15 = arith.constant 0.000000e+00 : f32
    %46 = vector.broadcast %cst_15 : f32 to vector<8x128xf32>
    %47 = arith.select %45, %18, %46 : vector<8x128xi1>, vector<8x128xf32>
    %c5_i32 = arith.constant 5 : i32
    %48 = tpu.dynamic_rotate %38 by %c5_i32 dim 1 : vector<8x128xf32>, i32 -> vector<8x128xf32>
    %c9_i32 = arith.constant 9 : i32
    %49 = vector.broadcast %c9_i32 : i32 to vector<8x128xi32>
    %50 = arith.cmpi eq, %19, %49 : vector<8x128xi32>
    %51 = arith.extui %50 : vector<8x128xi1> to vector<8x128xi32>
    %52 = arith.sitofp %51 : vector<8x128xi32> to vector<8x128xf32>
    %53 = vector.broadcast %43 : vector<8x1xf32> to vector<8x128xf32>
    %54 = arith.mulf %53, %52 : vector<8x128xf32>
    %55 = arith.addf %32, %47 : vector<8x128xf32>
    %56 = arith.addf %55, %48 : vector<8x128xf32>
    %57 = arith.addf %56, %54 : vector<8x128xf32>
    %c0_16 = arith.constant 0 : index
    %c0_17 = arith.constant 0 : index
    %58 = vector.load %arg3[%c0_16, %c0_17] : memref<8x128xf32, #tpu.memory_space<vmem>>, vector<8x128xf32>
    tpu.vector_store %arg3[%c0_16, %c0_17], %57 {strides = array<i32>} : memref<8x128xf32, #tpu.memory_space<vmem>>, vector<8x128xf32>,
    return
  }
  func.func @transform_0(%arg0: i32) -> (i32, i32) {
    %c0_i32 = arith.constant 0 : i32
    %c0_i32_0 = arith.constant 0 : i32
    return %arg0, %c0_i32 : i32, i32
  }
  func.func @transform_1(%arg0: i32) -> (i32, i32) {
    %c0_i32 = arith.constant 0 : i32
    %c0_i32_0 = arith.constant 0 : i32
    %c0_i32_1 = arith.constant 0 : i32
    return %c0_i32, %c0_i32_0 : i32, i32
  }
  func.func @transform_2(%arg0: i32) -> (i32, i32) {
    %c0_i32 = arith.constant 0 : i32
    %c0_i32_0 = arith.constant 0 : i32
    return %arg0, %c0_i32 : i32, i32
  }
}

</mosaic_0001>

<bundles_post_ra>
// kernel: policy_ppo_forward.1
= control target key start
LH: loop header
LB: loop body
LE: loop exit
PB: predicated region body
PF: predicated region fallthrough
CT: control target
= control target key end

     0   :  { %7 = vsyncpa [#allocation3], 0  ;;  %s657_s0 = inlined_call_operand.hbm [shape: f32[8,16], index: 0, kind: input, shape index: {}]   ;;  %s658_s1 = inlined_call_operand.hbm [shape: f32[280,128], index: 1, kind: input, shape index: {}]   ;;  %s659_s2 = inlined_call_operand.vmem [shape: f32[8,128], index: 2, kind: output, shape index: {}]  }
   0x1   :  { %8 = vsyncpa [#allocation5], 0  ;;  %s574_s9 = smov [#allocation2]   ;;  %s575_s11 = smov [#allocation4]  }
   0x2   :  { %s15_s10 = sshll.u32 %s574_s9, 4  ;;  %s24_s12 = sshll.u32 %s575_s11, 4  ;;  %s16_s10 = int_to_ptr.vmem [resolvable:$true] %s15_s10  ;;  %s597_s12 = int_to_ptr.vmem [resolvable:$true] %s24_s12 }
   0x3   :  { %s526_s15 = scalar_lea.hbm %s657_s0, 128 }
   0x4   :  { %p527_p0 = scmp.ne.s32.totalorder %s657_s0, %s526_s15  ;;  %p530_p1 = scmp.lt.u32.totalorder %s526_s15, %s657_s0 }
   0x6   :  { %p532_p2 = pnand %p530_p1, %p527_p0 }
   0x8   :  { %535 = shalt.err (!%p532_p2)
}
   0x9   :  { %s536_s20 = scalar_lea.vmem %s16_s10, 128  ;;  %p541_p4 = scmp.lt.s32.totalorder %s16_s10, %s16_s10 }
   0xa   :  { %p537_p3 = scmp.ne.s32.totalorder %s16_s10, %s536_s20  ;;  %p542_p5 = scmp.lt.s32.totalorder %s536_s20, %s536_s20 }
   0xc   :  { %p543_p6 = por %p542_p5, %p541_p4 }
   0xe   :  { %p544_p7 = pnand %p543_p6, %p537_p3 }
  0x10   :  { %547 = shalt.err (!%p544_p7)
}
  0x11   :  { %18 = dma.hbm_to_vmem [thread:$0]  %s657_s0, 128, %s16_s10, [#allocation3]  }
  0x12   :  { %s548_s25 = scalar_lea.hbm %s658_s1, 4480 }
  0x13   :  { %p549_p8 = scmp.ne.s32.totalorder %s658_s1, %s548_s25  ;;  %p552_p9 = scmp.lt.u32.totalorder %s548_s25, %s658_s1 }
  0x15   :  { %p554_p10 = pnand %p552_p9, %p549_p8 }
  0x17   :  { %557 = shalt.err (!%p554_p10)
}
  0x18   :  { %s558_s30 = scalar_lea.vmem %s597_s12, 4480  ;;  %p563_p12 = scmp.lt.s32.totalorder %s597_s12, %s597_s12 }
  0x19   :  { %p559_p11 = scmp.ne.s32.totalorder %s597_s12, %s558_s30  ;;  %p564_p13 = scmp.lt.s32.totalorder %s558_s30, %s558_s30 }
  0x1b   :  { %p565_p0 = por %p564_p13, %p563_p12 }
  0x1d   :  { %p566_p1 = pnand %p565_p0, %p559_p11 }
  0x1f   :  { %569 = shalt.err (!%p566_p1)
}
  0x20   :  { %s576_s0 = smov 128   ;;  %s577_s3 = smov 8  }
  0x21   :  { %30 = dma.hbm_to_vmem [thread:$0]  %s658_s1, 4480, %s597_s12, [#allocation5], %s576_s0, %s576_s0, %s577_s3  }
  0x22   :  { %570 = dma.done.wait [#allocation3], 128  }
  0x23   :  { %571 = vsyncadd [#allocation3], 4294967168 }
  0x24   :  { %572 = dma.done.wait [#allocation5], 4480  }
  0x25   :  { %573 = vsyncadd [#allocation5], 4294962816  ;;  %v578_v0 = vmov 0.0|0.0   ;;  %vm579_vm0 = vmmov 0   ;;  %v580_v1 = vmov 0.0   ;;  %v38_v2 = vld [vmem:[#allocation4] sm:$0xff]  ;;  %v73_v45 = vlaneseq }
  0x26   :  { %457 = vmatprep.subr.bf16.mxu0 %v578_v0  ;;  %384 = vmatprep.mubr.msk.f32.mxu0 %vm579_vm0, %v580_v1  ;;  %v39_v3 = vld [vmem:[#allocation4 + $0x8] sm:$0xff]  ;;  %v40_v5 = vld [vmem:[#allocation4 + $0x10] sm:$0xff]  ;;  %v41_v6 = vld [vmem:[#allocation4 + $0x18] sm:$0xff]  ;;  %vm77_vm1 = vcmask 130048   ;;  %s581_s1 = smov 5  }
  0x27   :  { %460 = vmatprep.subr.bf16.mxu1 %v578_v0  ;;  %419 = vmatprep.mubr.msk.f32.mxu1 %vm579_vm0, %v580_v1  ;;  %v458_v4 = vpack.c.bf16 %v39_v3, %v38_v2  ;;  %v42_v7 = vld [vmem:[#allocation4 + $0x20] sm:$0xff]  ;;  %v461_v8 = vpack.c.bf16 %v41_v6, %v40_v5  ;;  %v43_v9 = vld [vmem:[#allocation4 + $0x28] sm:$0xff]  ;;  %v37_v10 = vld [vmem:[#allocation2] sm:$0xff]  ;;  %v74_v46 = vshrl.u32 %v73_v45, 7 }
  0x28   :  { %v464_v11 = vpack.c.bf16 %v43_v9, %v42_v7  ;;  %v44_v12 = vld [vmem:[#allocation4 + $0x30] sm:$0xff]  ;;  %v45_v13 = vld [vmem:[#allocation4 + $0x38] sm:$0xff]  ;;  %v46_v15 = vld [vmem:[#allocation4 + $0x40] sm:$0xff] }
  0x29   :  { %459 = vmatpush3.bf16.msra.mxu0 %v458_v4  ;;  %462 = vmatpush3.bf16.msra.mxu1 %v461_v8  ;;  %v467_v14 = vpack.c.bf16 %v45_v13, %v44_v12  ;;  %v47_v16 = vld [vmem:[#allocation4 + $0x48] sm:$0xff]  ;;  %v48_v18 = vld [vmem:[#allocation4 + $0x50] sm:$0xff]  ;;  %v49_v19 = vld [vmem:[#allocation4 + $0x58] sm:$0xff]  ;;  %v75_v47 = vsub.s32 0, %v74_v46  ;;  %v154_v63 = vsub.s32 1, %v74_v46  ;;  %v229_v7 = vsub.s32 2, %v74_v46 }
  0x2a   :  { %484 = vmatprep.subr.bf16.mxu0 %v578_v0  ;;  %463 = vmatprep.subr.bf16.mxu1 %v578_v0  ;;  %v470_v17 = vpack.c.bf16 %v47_v16, %v46_v15  ;;  %v473_v20 = vpack.c.bf16 %v49_v19, %v48_v18  ;;  %v50_v21 = vld [vmem:[#allocation4 + $0x60] sm:$0xff]  ;;  %v51_v22 = vld [vmem:[#allocation4 + $0x68] sm:$0xff]  ;;  %v52_v24 = vld [vmem:[#allocation4 + $0x70] sm:$0xff]  ;;  %v302_v8 = vand.u32 127, %v73_v45 }
  0x2b   :  { %v476_v23 = vpack.c.bf16 %v51_v22, %v50_v21  ;;  %v53_v25 = vld [vmem:[#allocation4 + $0x78] sm:$0xff]  ;;  %v54_v27 = vld [vmem:[#allocation4 + $0x80] sm:$0xff]  ;;  %v55_v28 = vld [vmem:[#allocation4 + $0x88] sm:$0xff] }
  0x2c   :  { %385 = vmatmul.mubr.msk.f32.vlgmr.msra.gmra.mrb[0].mxu0 %vm77_vm1, %v37_v10  ;;  %v479_v26 = vpack.c.bf16 %v53_v25, %v52_v24  ;;  %v482_v29 = vpack.c.bf16 %v55_v28, %v54_v27  ;;  %v56_v30 = vld [vmem:[#allocation4 + $0x90] sm:$0xff]  ;;  %v57_v31 = vld [vmem:[#allocation4 + $0x98] sm:$0xff]  ;;  %v58_v32 = vld [vmem:[#allocation4 + $0xa0] sm:$0xff]  ;;  %vm303_vm2 = vcmp.lt.s32.totalorder %v302_v8, 4  ;;  %vm327_vm3 = vcmp.eq.s32.totalorder %v302_v8, 9 }
  0x2d   :  { %454 = vmatprep.mubr.msk.f32.mxu0 %vm579_vm0, %v580_v1  ;;  %465 = vmatpush3.bf16.msra.mxu1 %v464_v11  ;;  %v485_v33 = vpack.c.bf16 %v57_v31, %v56_v30  ;;  %v59_v34 = vld [vmem:[#allocation4 + $0xa8] sm:$0xff]  ;;  %v60_v36 = vld [vmem:[#allocation4 + $0xb0] sm:$0xff]  ;;  %v61_v37 = vld [vmem:[#allocation4 + $0xb8] sm:$0xff]  ;;  %vm323_vm4 = vcmp.eq.s32.totalorder %v302_v8, 4  ;;  %v342_v28 = vsel %vm327_vm3, 1.0, %v580_v1 }
  0x2e   :  { %466 = vmatprep.subr.bf16.mxu1 %v578_v0  ;;  %v488_v35 = vpack.c.bf16 %v59_v34, %v58_v32  ;;  %v491_v38 = vpack.c.bf16 %v61_v37, %v60_v36  ;;  %v62_v39 = vld [vmem:[#allocation4 + $0xc0] sm:$0xff]  ;;  %v63_v40 = vld [vmem:[#allocation4 + $0xc8] sm:$0xff]  ;;  %v64_v42 = vld [vmem:[#allocation4 + $0xd0] sm:$0xff] }
  0x2f   :  { %486 = vmatpush3.bf16.msra.mxu0 %v485_v33  ;;  %v494_v41 = vpack.c.bf16 %v63_v40, %v62_v39  ;;  %v65_v43 = vld [vmem:[#allocation4 + $0xd8] sm:$0xff]  ;;  %v72_v48 = vld [vmem:[#allocation4 + $0x110] sm:$0xff]  ;;  %v66_v54 = vld [vmem:[#allocation4 + $0xe0] sm:$0xff] }
  0x30   :  { %487 = vmatprep.subr.bf16.mxu0 %v578_v0  ;;  %v497_v44 = vpack.c.bf16 %v65_v43, %v64_v42  ;;  %v76_v49 = vrot.slane %v72_v48, %v75_v47  ;;  %v67_v55 = vld [vmem:[#allocation4 + $0xe8] sm:$0xff]  ;;  %v68_v57 = vld [vmem:[#allocation4 + $0xf0] sm:$0xff]  ;;  %v69_v58 = vld [vmem:[#allocation4 + $0xf8] sm:$0xff]  ;;  %v155_v2 = vrot.slane %v72_v48, %v154_v63  ;;  %v230_v9 = vrot.slane %v72_v48, %v229_v7 }
  0x31   :  { %468 = vmatpush3.bf16.msra.mxu1 %v467_v14  ;;  %v500_v56 = vpack.c.bf16 %v67_v55, %v66_v54  ;;  %v503_v59 = vpack.c.bf16 %v69_v58, %v68_v57  ;;  %v70_v60 = vld [vmem:[#allocation4 + $0x100] sm:$0xff]  ;;  %v71_v61 = vld [vmem:[#allocation4 + $0x108] sm:$0xff] }
  0x32   :  { %469 = vmatprep.subr.bf16.mxu1 %v578_v0  ;;  %v506_v62 = vpack.c.bf16 %v71_v61, %v70_v60 }
  0x33   :  { %489 = vmatpush3.bf16.msra.mxu0 %v488_v35 }
  0x34   :  { %490 = vmatprep.subr.bf16.mxu0 %v578_v0 }
  0x35   :  { %471 = vmatpush3.bf16.msra.mxu1 %v470_v17 }
  0x36   :  { %472 = vmatprep.subr.bf16.mxu1 %v578_v0 }
  0x37   :  { %492 = vmatpush3.bf16.msra.mxu0 %v491_v38 }
  0x38   :  { %493 = vmatprep.subr.bf16.mxu0 %v578_v0 }
  0x39   :  { %474 = vmatpush3.bf16.msra.mxu1 %v473_v20 }
  0x3a   :  { %475 = vmatprep.subr.bf16.mxu1 %v578_v0 }
  0x3b   :  { %495 = vmatpush3.bf16.msra.mxu0 %v494_v41 }
  0x3c   :  { %496 = vmatprep.subr.bf16.mxu0 %v578_v0 }
  0x3d   :  { %477 = vmatpush3.bf16.msra.mxu1 %v476_v23 }
  0x3e   :  { %478 = vmatprep.subr.bf16.mxu1 %v578_v0 }
  0x3f   :  { %498 = vmatpush3.bf16.msra.mxu0 %v497_v44 }
  0x40   :  { %499 = vmatprep.subr.bf16.mxu0 %v578_v0 }
  0x41   :  { %480 = vmatpush3.bf16.msra.mxu1 %v479_v26 }
  0x42   :  { %481 = vmatprep.subr.bf16.mxu1 %v578_v0 }
  0x43   :  { %501 = vmatpush3.bf16.msra.mxu0 %v500_v56 }
  0x44   :  { %502 = vmatprep.subr.bf16.mxu0 %v578_v0 }
  0x45   :  { %483 = vmatpush3.bf16.msra.mxu1 %v482_v29 }
  0x47   :  { %504 = vmatpush3.bf16.msra.mxu0 %v503_v59 }
  0x48   :  { %505 = vmatprep.subr.bf16.mxu0 %v578_v0 }
  0x4b   :  { %507 = vmatpush3.bf16.msra.mxu0 %v506_v62 }
  0xff   :  { %v147_v50 = vpop.f32.mrb[0].mxu0 }
 0x100   :  { %v148_v51 = vadd.f32 %v147_v50, %v76_v49  ;;  %v386_v52 = vpop.f32.mrb[1].mxu0 }
 0x102   :  { %516 = vtanh.f32 %v148_v51 }
 0x10c   :  { %v517_v53 = vpop.eup %516 }
 0x10d   :  { %420 = vmatmul.mubr.f32.vlgmr.msra.gmra.mrb[0].mxu1 %v517_v53 }
 0x1e0   :  { %v222_v3 = vpop.f32.mrb[0].mxu1 }
 0x1e1   :  { %v223_v4 = vadd.f32 %v222_v3, %v155_v2  ;;  %v421_v5 = vpop.f32.mrb[1].mxu1 }
 0x1e3   :  { %518 = vtanh.f32 %v223_v4 }
 0x1ed   :  { %v519_v6 = vpop.eup %518 }
 0x1ee   :  { %455 = vmatmul.mubr.f32.vlgmr.msra.gmra.mrb[2].mxu0 %v519_v6 }
 0x2c1   :  { %v297_v10 = vpop.f32.mrb[2].mxu0 }
 0x2c2   :  { %v298_v11 = vadd.f32 %v297_v10, %v230_v9  ;;  %v456_v12 = vpop.f32.mrb[3].mxu0 }
 0x2c4   :  { %v304_v13 = vsel %vm303_vm2, %v298_v11, -1e+30  ;;  %v324_v29 = vsel %vm323_vm4, %v298_v11, 0.0 }
 0x2c5   :  { %305 = vmax.xlane.f32.xlu0 %v304_v13 }
 0x352   :  { %v306_v0 = vpop.xlane.xlu0 %305 }
 0x353   :  { %v307_v14 = vsub.f32 %v304_v13, %v306_v0 }
 0x355   :  { %v308_v15 = vmul.f32 1.442695, %v307_v14 }
 0x357   :  { %520 = vpow2.f32 %v308_v15 }
 0x361   :  { %v521_v16 = vpop.eup %520 }
 0x362   :  { %310 = vadd.xlane.f32.xlu0 %v521_v16 }
 0x3ef   :  { %v311_v17 = vpop.xlane.xlu0 %310 }
 0x3f0   :  { %522 = vlog2.f32 %v311_v17 }
 0x3f1   :  { %524 = vrcp.f32 %v311_v17 }
 0x3fa   :  { %v523_v18 = vpop.eup %522 }
 0x3fb   :  { %v315_v19 = vmul.f32 0.6931472, %v523_v18  ;;  %v525_v20 = vpop.eup %524 }
 0x3fc   :  { %v313_v23 = vmul.f32 %v525_v20, %v521_v16 }
 0x3fd   :  { %v316_v21 = vadd.f32 %v315_v19, %v306_v0 }
 0x3fe   :  { %v331_v30 = vadd.f32 %v324_v29, %v313_v23 }
 0x3ff   :  { %v317_v22 = vsub.f32 %v298_v11, %v316_v21 }
 0x401   :  { %v318_v24 = vsel %vm303_vm2, %v317_v22, 0.0 }
 0x402   :  { %v319_v25 = vmul.f32 %v318_v24, %v313_v23 }
 0x404   :  { %320 = vadd.xlane.f32.xlu1 %v319_v25 }
 0x415   :  { %325 = vrot.lane.b32.xlu1 %v318_v24, %s581_s1 }
 0x491   :  { %v321_v26 = vpop.xlane.xlu1 %320 }
 0x492   :  { %v322_v27 = vsub.f32 0.0, %v321_v26 }
 0x494   :  { %v330_v32 = vmul.f32 %v342_v28, %v322_v27 }
 0x495   :  { %v326_v31 = vpop.permute.xlu1 %325 }
 0x496   :  { %v332_v33 = vadd.f32 %v331_v30, %v326_v31 }
 0x498   :  { %v333_v34 = vadd.f32 %v332_v33, %v330_v32 }
 0x49a   :  { %334 = vst [vmem:[%s659_s2] sm:$0xff] %v333_v34 }
 0x49b   :  { %339 = vsyncpa [#allocation3], 1 }
 0x49c   :  { %340 = vsyncpa [#allocation5], 1 }

</bundles_post_ra>
